<compile_context>
chip_gen: v7x
topology: tpu7x:2x2x1
jax: 0.10.0
libtpu: 0.0.40
codegen_flags: <defaults>
</compile_context>

<pallas_src>
import jax
import jax.numpy as jnp
from jax import lax
from jax.experimental import pallas as pl
from jax.experimental.pallas import tpu as pltpu

SCALE_FACTOR = 4.0
DROPOUT_P = 0.5
KEEP_P = 1.0 - DROPOUT_P


def sdpa_kernel(x1_ref, x2_ref, u_ref, o_ref):
    q = x1_ref[...]            # [bm, D]
    k = x2_ref[...]            # [N, D]
    u = u_ref[...]             # [bm, N] uniform randoms in [0, 1)

    # v1 = x1 @ x2^T ; v2 = v1 * scale
    # Contract over the last dim of BOTH operands (no materialized transpose).
    s = lax.dot_general(
        q, k,
        dimension_numbers=(((1,), (1,)), ((), ())),
        preferred_element_type=jnp.float32,
    ) * SCALE_FACTOR                                      # [bm, N]

    # v3 = softmax over the last dim (PyTorch implicit dim=-1 for 2-D input)
    s = s - jnp.max(s, axis=-1, keepdims=True)
    e = jnp.exp(s)
    inv = 1.0 / jnp.sum(e, axis=-1, keepdims=True)        # softmax denom

    # v4 = dropout(p=0.5): keep w.p. 0.5, scale kept values by 1/(1-p).
    # Fused with softmax normalization into one broadcasted multiply:
    #   where(keep, e, 0) * (inv / keep_p) == dropout(softmax(s)).
    keep = u < KEEP_P
    p = jnp.where(keep, e, 0.0) * (inv * (1.0 / KEEP_P))  # [bm, N]

    # v5 = v4 @ x2
    o_ref[...] = jnp.dot(
        p.astype(k.dtype), k, preferred_element_type=jnp.float32
    ).astype(o_ref.dtype)


def model_forward(x1, x2, key):
    M, D = x1.shape
    N, D2 = x2.shape
    assert D == D2, "inner dims must match: x1 [M,D], x2 [N,D]"

    # Tile over M (independent rows) so the kernel scales past toy sizes;
    # N stays resident per tile (full-row softmax), x2 resident per tile.
    bm = min(M, 128)
    grid = (pl.cdiv(M, bm),)

    # Host-side dropout randomness (one uniform per score element).
    u = jax.random.uniform(key, (M, N), dtype=jnp.float32)

    return pl.pallas_call(
        sdpa_kernel,
        out_shape=jax.ShapeDtypeStruct((M, D), jnp.float32),
        grid=grid,
        in_specs=[
            pl.BlockSpec((bm, D), lambda i: (i, 0)),   # x1 tile
            pl.BlockSpec((N, D), lambda i: (0, 0)),    # x2 (resident)
            pl.BlockSpec((bm, N), lambda i: (i, 0)),   # dropout uniforms
        ],
        out_specs=pl.BlockSpec((bm, D), lambda i: (i, 0)),
        compiler_params=pltpu.CompilerParams(
            # M axis is embarrassingly parallel -> shards across v7x's 2 TCs,
            # neutral on v5e/v6e.
            dimension_semantics=("parallel",),
        ),
    )(x1, x2, u)


if __name__ == "__main__":
    key = jax.random.PRNGKey(0)
    k1, k2, k3 = jax.random.split(key, 3)
    M, N, D = 8, 128, 128
    x1 = jax.random.normal(k1, (M, D), dtype=jnp.float32)
    x2 = jax.random.normal(k2, (N, D), dtype=jnp.float32)

    out = model_forward(x1, x2, k3)
    jax.block_until_ready(out)
    assert out.shape == (M, D) and out.dtype == jnp.float32
    assert bool(jnp.all(jnp.isfinite(out)))
    print("KERNEL_OK")
</pallas_src>

<mosaic_0001>
module attributes {stable_mosaic.version = 11 : i64} {
  func.func @sdpa_kernel(%arg0: i32, %arg1: memref<8x128xf32, #tpu.memory_space<vmem>>, %arg2: memref<128x128xf32, #tpu.memory_space<vmem>>, %arg3: memref<8x128xf32, #tpu.memory_space<vmem>>, %arg4: memref<8x128xf32, #tpu.memory_space<vmem>>) attributes {dimension_semantics = [#tpu.dimension_semantics<parallel>], iteration_bounds = array<i64: 1>, scalar_prefetch = 0 : i64, scratch_operands = 0 : i64, tpu.core_type = #tpu.core_type<tc>, window_params = [{transform_indices = @transform_0, window_bounds = array<i64: 8, 128>}, {pipeline_mode = #tpu.pipeline_mode<synchronous>, transform_indices = @transform_1, window_bounds = array<i64: 128, 128>}, {transform_indices = @transform_2, window_bounds = array<i64: 8, 128>}, {transform_indices = @transform_3, window_bounds = array<i64: 8, 128>}]} {
    %c0 = arith.constant 0 : index
    %c0_0 = arith.constant 0 : index
    %0 = vector.load %arg1[%c0, %c0_0] : memref<8x128xf32, #tpu.memory_space<vmem>>, vector<8x128xf32>
    %c0_1 = arith.constant 0 : index
    %c0_2 = arith.constant 0 : index
    %1 = vector.load %arg2[%c0_1, %c0_2] : memref<128x128xf32, #tpu.memory_space<vmem>>, vector<128x128xf32>
    %c0_3 = arith.constant 0 : index
    %c0_4 = arith.constant 0 : index
    %2 = vector.load %arg3[%c0_3, %c0_4] : memref<8x128xf32, #tpu.memory_space<vmem>>, vector<8x128xf32>
    %cst = arith.constant dense<0.000000e+00> : vector<8x128xf32>
    %3 = tpu.matmul %0, %1, %cst {dimension_numbers = #tpu.dot_dimension_numbers<[1], [1], [0], [0], [0, 0, 1, 0], [], []>} : vector<8x128xf32>, vector<128x128xf32>, vector<8x128xf32> -> vector<8x128xf32>
    %cst_5 = arith.constant 4.000000e+00 : f32
    %4 = vector.broadcast %cst_5 : f32 to vector<8x128xf32>
    %5 = arith.mulf %3, %4 : vector<8x128xf32>
    %cst_6 = arith.constant dense<0xFF800000> : vector<8xf32>
    %6 = vector.multi_reduction <maximumf>, %5, %cst_6 [1] : vector<8x128xf32> to vector<8xf32>
    %7 = vector.shape_cast %6 : vector<8xf32> to vector<8x1xf32>
    %8 = vector.broadcast %7 : vector<8x1xf32> to vector<8x128xf32>
    %9 = arith.subf %5, %8 : vector<8x128xf32>
    %10 = math.exp %9 : vector<8x128xf32>
    %cst_7 = arith.constant dense<0.000000e+00> : vector<8xf32>
    %11 = vector.multi_reduction <add>, %10, %cst_7 [1] : vector<8x128xf32> to vector<8xf32>
    %12 = vector.shape_cast %11 : vector<8xf32> to vector<8x1xf32>
    %cst_8 = arith.constant 1.000000e+00 : f32
    %13 = vector.broadcast %cst_8 : f32 to vector<8x1xf32>
    %14 = arith.divf %13, %12 : vector<8x1xf32>
    %cst_9 = arith.constant 5.000000e-01 : f32
    %15 = vector.broadcast %cst_9 : f32 to vector<8x128xf32>
    %16 = arith.cmpf olt, %2, %15 : vector<8x128xf32>
    %cst_10 = arith.constant 0.000000e+00 : f32
    %17 = vector.broadcast %cst_10 : f32 to vector<8x128xf32>
    %18 = arith.select %16, %10, %17 : vector<8x128xi1>, vector<8x128xf32>
    %cst_11 = arith.constant 2.000000e+00 : f32
    %19 = vector.broadcast %cst_11 : f32 to vector<8x1xf32>
    %20 = arith.mulf %14, %19 : vector<8x1xf32>
    %21 = vector.broadcast %20 : vector<8x1xf32> to vector<8x128xf32>
    %22 = arith.mulf %18, %21 : vector<8x128xf32>
    %cst_12 = arith.constant dense<0.000000e+00> : vector<8x128xf32>
    %23 = tpu.matmul %22, %1, %cst_12 {dimension_numbers = #tpu.dot_dimension_numbers<[1], [0], [0], [1], [0, 0, 1, 1], [], []>} : vector<8x128xf32>, vector<128x128xf32>, vector<8x128xf32> -> vector<8x128xf32>
    %c0_13 = arith.constant 0 : index
    %c0_14 = arith.constant 0 : index
    %24 = vector.load %arg4[%c0_13, %c0_14] : memref<8x128xf32, #tpu.memory_space<vmem>>, vector<8x128xf32>
    tpu.vector_store %arg4[%c0_13, %c0_14], %23 {strides = array<i32>} : memref<8x128xf32, #tpu.memory_space<vmem>>, vector<8x128xf32>,
    return
  }
  func.func @transform_0(%arg0: i32) -> (i32, i32) {
    %c0_i32 = arith.constant 0 : i32
    %c0_i32_0 = arith.constant 0 : i32
    return %arg0, %c0_i32 : i32, i32
  }
  func.func @transform_1(%arg0: i32) -> (i32, i32) {
    %c0_i32 = arith.constant 0 : i32
    %c0_i32_0 = arith.constant 0 : i32
    %c0_i32_1 = arith.constant 0 : i32
    return %c0_i32, %c0_i32_0 : i32, i32
  }
  func.func @transform_2(%arg0: i32) -> (i32, i32) {
    %c0_i32 = arith.constant 0 : i32
    %c0_i32_0 = arith.constant 0 : i32
    return %arg0, %c0_i32 : i32, i32
  }
  func.func @transform_3(%arg0: i32) -> (i32, i32) {
    %c0_i32 = arith.constant 0 : i32
    %c0_i32_0 = arith.constant 0 : i32
    return %arg0, %c0_i32 : i32, i32
  }
}

</mosaic_0001>

<bundles_post_ra>
// kernel: tpu_custom_call.1
= control target key start
LH: loop header
LB: loop body
LE: loop exit
PB: predicated region body
PF: predicated region fallthrough
CT: control target
= control target key end

     0   :  { %8 = vsyncpa [#allocation3], 0  ;;  %s577_s0 = inlined_call_operand.hbm [shape: f32[8,128], index: 0, kind: input, shape index: {}]   ;;  %s578_s1 = inlined_call_operand.hbm [shape: f32[128,128], index: 1, kind: input, shape index: {}]   ;;  %s579_s2 = inlined_call_operand.hbm [shape: f32[8,128], index: 2, kind: input, shape index: {}]   ;;  %s580_s3 = inlined_call_operand.hbm [shape: f32[8,128], index: 3, kind: output, shape index: {}]  }
   0x1   :  { %9 = vsyncpa [#allocation6], 0 }
   0x2   :  { %10 = vsyncpa [#allocation4], 0  ;;  %s500_s12 = smov [#allocation5]   ;;  %s406_s16 = scalar_lea.hbm %s578_s1, 2048 }
   0x3   :  { %s26_s13 = sshll.u32 %s500_s12, 4  ;;  %p407_p0 = scmp.ne.s32.totalorder %s578_s1, %s406_s16  ;;  %s27_s13 = int_to_ptr.vmem [resolvable:$true] %s26_s13 }
   0x4   :  { %p410_p1 = scmp.lt.u32.totalorder %s406_s16, %s578_s1 }
   0x6   :  { %p412_p2 = pnand %p410_p1, %p407_p0 }
   0x8   :  { %415 = shalt.err (!%p412_p2)
}
   0x9   :  { %s416_s21 = scalar_lea.vmem %s27_s13, 2048  ;;  %p421_p4 = scmp.lt.s32.totalorder %s27_s13, %s27_s13 }
   0xa   :  { %p417_p3 = scmp.ne.s32.totalorder %s27_s13, %s416_s21  ;;  %p422_p5 = scmp.lt.s32.totalorder %s416_s21, %s416_s21 }
   0xc   :  { %p423_p6 = por %p422_p5, %p421_p4 }
   0xe   :  { %p424_p7 = pnand %p423_p6, %p417_p3 }
  0x10   :  { %427 = shalt.err (!%p424_p7)
}
  0x11   :  { %s501_s22 = smov 128   ;;  %s502_s23 = smov 8  }
  0x12   :  { %32 = dma.hbm_to_vmem [thread:$0]  %s578_s1, 2048, %s27_s13, [#allocation6], %s501_s22, %s501_s22, %s502_s23  }
  0x13   :  { %s503_s26 = smov [#allocation2]   ;;  %s504_s28 = smov [#allocation7]  }
  0x14   :  { %s17_s27 = sshll.u32 %s503_s26, 4  ;;  %s39_s29 = sshll.u32 %s504_s28, 4  ;;  %s18_s27 = int_to_ptr.vmem [resolvable:$true] %s17_s27  ;;  %s40_s29 = int_to_ptr.vmem [resolvable:$true] %s39_s29 }
  0x15   :  { %s428_s5 = scalar_lea.hbm %s577_s0, 128 }
  0x16   :  { %p429_p8 = scmp.ne.s32.totalorder %s577_s0, %s428_s5  ;;  %p432_p9 = scmp.lt.u32.totalorder %s428_s5, %s577_s0 }
  0x18   :  { %p434_p10 = pnand %p432_p9, %p429_p8 }
  0x1a   :  { %437 = shalt.err (!%p434_p10)
}
  0x1b   :  { %s438_s1 = scalar_lea.vmem %s18_s27, 128  ;;  %p443_p12 = scmp.lt.s32.totalorder %s18_s27, %s18_s27 }
  0x1c   :  { %p439_p11 = scmp.ne.s32.totalorder %s18_s27, %s438_s1  ;;  %p444_p13 = scmp.lt.s32.totalorder %s438_s1, %s438_s1 }
  0x1e   :  { %p445_p0 = por %p444_p13, %p443_p12 }
  0x20   :  { %p446_p1 = pnand %p445_p0, %p439_p11 }
  0x22   :  { %449 = shalt.err (!%p446_p1)
}
  0x23   :  { %20 = dma.hbm_to_vmem [thread:$0]  %s577_s0, 128, %s18_s27, [#allocation3]  }
  0x24   :  { %s450_s14 = scalar_lea.hbm %s579_s2, 128 }
  0x25   :  { %p451_p2 = scmp.ne.s32.totalorder %s579_s2, %s450_s14  ;;  %p454_p3 = scmp.lt.u32.totalorder %s450_s14, %s579_s2 }
  0x27   :  { %p456_p4 = pnand %p454_p3, %p451_p2 }
  0x29   :  { %459 = shalt.err (!%p456_p4)
}
  0x2a   :  { %s460_s19 = scalar_lea.vmem %s40_s29, 128  ;;  %p465_p6 = scmp.lt.s32.totalorder %s40_s29, %s40_s29 }
  0x2b   :  { %p461_p5 = scmp.ne.s32.totalorder %s40_s29, %s460_s19  ;;  %p466_p7 = scmp.lt.s32.totalorder %s460_s19, %s460_s19 }
  0x2d   :  { %p467_p8 = por %p466_p7, %p465_p6 }
  0x2f   :  { %p468_p9 = pnand %p467_p8, %p461_p5 }
  0x31   :  { %471 = shalt.err (!%p468_p9)
}
  0x32   :  { %42 = dma.hbm_to_vmem [thread:$0]  %s579_s2, 128, %s40_s29, [#allocation6]  }
  0x33   :  { %494 = dma.done.wait [#allocation3], 128  }
  0x34   :  { %495 = vsyncadd [#allocation3], 4294967168 }
  0x35   :  { %496 = dma.done.wait [#allocation6], 2176  }
  0x36   :  { %497 = vsyncadd [#allocation6], 4294965120  ;;  %v505_v0 = vmov 0.0|0.0   ;;  %vm506_vm0 = vmmov 0   ;;  %v507_v1 = vmov 0.0   ;;  %v53_v2 = vld [vmem:[#allocation5] sm:$0xff] }
  0x37   :  { %345 = vmatprep.subr.bf16.mxu0 %v505_v0  ;;  %307 = vmatprep.mubr.msk.f32.mxu0 %vm506_vm0, %v507_v1  ;;  %v54_v3 = vld [vmem:[#allocation5 + $0x8] sm:$0xff]  ;;  %v55_v5 = vld [vmem:[#allocation5 + $0x10] sm:$0xff]  ;;  %v56_v6 = vld [vmem:[#allocation5 + $0x18] sm:$0xff]  ;;  %s508_s2 = smov [#allocation8]  }
  0x38   :  { %369 = vmatprep.subr.bf16.mxu1 %v505_v0  ;;  %342 = vmatprep.mubr.msk.f32.mxu1 %vm506_vm0, %v507_v1  ;;  %v346_v4 = vpack.c.bf16 %v54_v3, %v53_v2  ;;  %v349_v7 = vpack.c.bf16 %v56_v6, %v55_v5  ;;  %v57_v8 = vld [vmem:[#allocation5 + $0x20] sm:$0xff]  ;;  %v58_v9 = vld [vmem:[#allocation5 + $0x28] sm:$0xff]  ;;  %v59_v11 = vld [vmem:[#allocation5 + $0x30] sm:$0xff]  ;;  %s231_s21 = sshll.u32 %s508_s2, 4  ;;  %s232_s21 = int_to_ptr.vmem [resolvable:$true] %s231_s21 }
  0x39   :  { %v352_v10 = vpack.c.bf16 %v58_v9, %v57_v8  ;;  %v60_v12 = vld [vmem:[#allocation5 + $0x38] sm:$0xff]  ;;  %v61_v14 = vld [vmem:[#allocation5 + $0x40] sm:$0xff]  ;;  %v62_v15 = vld [vmem:[#allocation5 + $0x48] sm:$0xff]  ;;  %s472_s22 = scalar_lea.vmem %s232_s21, 128  ;;  %p477_p11 = scmp.lt.s32.totalorder %s232_s21, %s232_s21 }
  0x3a   :  { %347 = vmatpush3.bf16.xpose.msra.mxu0 %v346_v4  ;;  %371 = vmatpush3.bf16.msra.mxu1 %v346_v4  ;;  %v355_v13 = vpack.c.bf16 %v60_v12, %v59_v11  ;;  %v358_v16 = vpack.c.bf16 %v62_v15, %v61_v14  ;;  %v63_v17 = vld [vmem:[#allocation5 + $0x50] sm:$0xff]  ;;  %v64_v18 = vld [vmem:[#allocation5 + $0x58] sm:$0xff]  ;;  %v65_v20 = vld [vmem:[#allocation5 + $0x60] sm:$0xff]  ;;  %p473_p10 = scmp.ne.s32.totalorder %s232_s21, %s472_s22  ;;  %p478_p12 = scmp.lt.s32.totalorder %s472_s22, %s472_s22 }
  0x3b   :  { %348 = vmatprep.subr.bf16.mxu0 %v505_v0  ;;  %372 = vmatprep.subr.bf16.mxu1 %v505_v0  ;;  %v361_v19 = vpack.c.bf16 %v64_v18, %v63_v17  ;;  %v66_v21 = vld [vmem:[#allocation5 + $0x68] sm:$0xff]  ;;  %v67_v23 = vld [vmem:[#allocation5 + $0x70] sm:$0xff]  ;;  %v68_v24 = vld [vmem:[#allocation5 + $0x78] sm:$0xff] }
  0x3c   :  { %v364_v22 = vpack.c.bf16 %v66_v21, %v65_v20  ;;  %v367_v25 = vpack.c.bf16 %v68_v24, %v67_v23  ;;  %v52_v26 = vld [vmem:[#allocation2] sm:$0xff]  ;;  %v69_v35 = vld [vmem:[#allocation7] sm:$0xff]  ;;  %p479_p13 = por %p478_p12, %p477_p11 }
  0x3d   :  { %vm150_vm1 = vcmp.lt.f32.partialorder %v69_v35, 0.5 }
  0x3e   :  { %374 = vmatpush3.bf16.msra.mxu1 %v349_v7  ;;  %p480_p0 = pnand %p479_p13, %p473_p10 }
  0x3f   :  { %375 = vmatprep.subr.bf16.mxu1 %v505_v0 }
  0x42   :  { %350 = vmatpush3.bf16.xpose.msra.mxu0 %v349_v7  ;;  %377 = vmatpush3.bf16.msra.mxu1 %v352_v10 }
  0x43   :  { %351 = vmatprep.subr.bf16.mxu0 %v505_v0  ;;  %378 = vmatprep.subr.bf16.mxu1 %v505_v0 }
  0x46   :  { %380 = vmatpush3.bf16.msra.mxu1 %v355_v13 }
  0x47   :  { %381 = vmatprep.subr.bf16.mxu1 %v505_v0 }
  0x4a   :  { %353 = vmatpush3.bf16.xpose.msra.mxu0 %v352_v10  ;;  %383 = vmatpush3.bf16.msra.mxu1 %v358_v16 }
  0x4b   :  { %354 = vmatprep.subr.bf16.mxu0 %v505_v0  ;;  %384 = vmatprep.subr.bf16.mxu1 %v505_v0 }
  0x4e   :  { %386 = vmatpush3.bf16.msra.mxu1 %v361_v19 }
  0x4f   :  { %387 = vmatprep.subr.bf16.mxu1 %v505_v0 }
  0x52   :  { %356 = vmatpush3.bf16.xpose.msra.mxu0 %v355_v13  ;;  %389 = vmatpush3.bf16.msra.mxu1 %v364_v22 }
  0x53   :  { %357 = vmatprep.subr.bf16.mxu0 %v505_v0  ;;  %390 = vmatprep.subr.bf16.mxu1 %v505_v0 }
  0x56   :  { %392 = vmatpush3.bf16.msra.mxu1 %v367_v25 }
  0x5a   :  { %359 = vmatpush3.bf16.xpose.msra.mxu0 %v358_v16 }
  0x5b   :  { %360 = vmatprep.subr.bf16.mxu0 %v505_v0 }
  0x62   :  { %362 = vmatpush3.bf16.xpose.msra.mxu0 %v361_v19 }
  0x63   :  { %363 = vmatprep.subr.bf16.mxu0 %v505_v0 }
  0x6a   :  { %365 = vmatpush3.bf16.xpose.msra.mxu0 %v364_v22 }
  0x6b   :  { %366 = vmatprep.subr.bf16.mxu0 %v505_v0 }
  0x72   :  { %368 = vmatpush3.bf16.xpose.msra.mxu0 %v367_v25 }
  0x79   :  { %308 = vmatmul.mubr.f32.vlgmr.msra.gmra.mrb[0].mxu0 %v52_v26 }
 0x14c   :  { %v136_v27 = vpop.f32.mrb[0].mxu0 }
 0x14d   :  { %v140_v28 = vmul.f32 4.0, %v136_v27  ;;  %v309_v29 = vpop.f32.mrb[1].mxu0 }
 0x14f   :  { %141 = vmax.xlane.f32.xlu0 %v140_v28 }
 0x1dc   :  { %v142_v30 = vpop.xlane.xlu0 %141 }
 0x1dd   :  { %v143_v31 = vsub.f32 %v140_v28, %v142_v30 }
 0x1df   :  { %v144_v32 = vmul.f32 1.442695, %v143_v31 }
 0x1e1   :  { %402 = vpow2.f32 %v144_v32 }
 0x1eb   :  { %v403_v33 = vpop.eup %402 }
 0x1ec   :  { %146 = vadd.xlane.f32.xlu0 %v403_v33  ;;  %v151_v38 = vsel %vm150_vm1, %v403_v33, 0.0 }
 0x279   :  { %v147_v34 = vpop.xlane.xlu0 %146 }
 0x27a   :  { %404 = vrcp.f32 %v147_v34 }
 0x284   :  { %v405_v36 = vpop.eup %404 }
 0x285   :  { %v152_v37 = vmul.f32 2.0, %v405_v36 }
 0x287   :  { %v153_v39 = vmul.f32 %v152_v37, %v151_v38 }
 0x289   :  { %343 = vmatmul.mubr.f32.vlgmr.msra.gmra.mrb[0].mxu1 %v153_v39 }
 0x35c   :  { %v220_v40 = vpop.f32.mrb[0].mxu1 }
 0x35d   :  { %224 = vst [vmem:[#allocation8] sm:$0xff] %v220_v40  ;;  %v344_v41 = vpop.f32.mrb[1].mxu1 }
 0x35e   :  { %483 = shalt.err (!%p480_p0)
}
 0x35f   :  { %s484_s25 = scalar_lea.hbm %s580_s3, 128 }
 0x360   :  { %p485_p1 = scmp.ne.s32.totalorder %s580_s3, %s484_s25  ;;  %p488_p2 = scmp.lt.u32.totalorder %s484_s25, %s580_s3 }
 0x362   :  { %p490_p3 = pnand %p488_p2, %p485_p1 }
 0x364   :  { %493 = shalt.err (!%p490_p3)
}
 0x365   :  { %234 = dma.vmem_to_hbm [thread:$0]  %s232_s21, 128, %s580_s3, [#allocation4]  }
 0x366   :  { %498 = dma.done.wait [#allocation4], 128  }
 0x367   :  { %499 = vsyncadd [#allocation4], 4294967168 }
 0x368   :  { %238 = vsyncpa [#allocation3], 1 }
 0x369   :  { %239 = vsyncpa [#allocation6], 1 }
 0x36a   :  { %240 = vsyncpa [#allocation4], 1 }

</bundles_post_ra>
